<compile_context>
chip_gen: v5e
topology: v5e:2x2
jax: 0.10.0
libtpu: 0.0.40
codegen_flags: <defaults>
</compile_context>

<pallas_src>
import functools

import jax
import jax.numpy as jnp
from jax.experimental import pallas as pl
from jax.experimental.pallas import tpu as pltpu


# ----------------------------------------------------------------------------
# Kernel: one (row_tile, C) slab of one batch element per grid step.
# ----------------------------------------------------------------------------
def _cm_attn_kernel(x_ref, q_ref, v1_ref, wkv_ref, bkv_ref, wproj_ref,
                    bproj_ref, o_ref, *, C, Dh, compute_dtype):
    f32 = jnp.float32

    x = x_ref[0].astype(compute_dtype)            # (TN, C)  in-kernel cast
    q = q_ref[0].astype(f32)                      # (2, Dh)  already scaled
    v1 = v1_ref[0].astype(f32)                    # (2, Dh)

    # kv projection: the dominant MXU matmul, f32 accumulation.
    kv = jnp.dot(x, wkv_ref[...], preferred_element_type=f32) + bkv_ref[...]

    # Layout of kv columns: [k_h0 | k_h1 | v2_h0 | v2_h1], each Dh wide.
    k0 = kv[:, :Dh]
    k1 = kv[:, Dh:2 * Dh]
    vs0 = v1[0:1, :] + kv[:, C:C + Dh]            # v1_h0 + v2_h0   (TN, Dh)
    vs1 = v1[1:2, :] + kv[:, C + Dh:]             # v1_h1 + v2_h1   (TN, Dh)
    kd = k0 - k1                                  # logit-difference operand
    dv = vs0 - vs1

    # Per-query-head 1x2 softmax + blend, folded into the output projection
    # (accumulate over per-head K-slices of wproj -> lane-dense (TN, C) result).
    proj = None
    for i in range(2):                            # H == 2 query heads
        qi = q[i:i + 1, :]                                          # (1, Dh)
        d = jnp.sum(kd * qi, axis=1, keepdims=True)                 # l_i0-l_i1
        a0 = 0.5 * (jnp.tanh(0.5 * d) + 1.0)                        # sigmoid(d)
        head = a0 * dv + vs1                                        # a0*vs0+(1-a0)*vs1
        w_i = wproj_ref[i * Dh:(i + 1) * Dh, :]                     # (Dh, C)
        contrib = jnp.dot(head.astype(compute_dtype), w_i,
                          preferred_element_type=f32)               # (TN, C)
        proj = contrib if proj is None else proj + contrib

    o_ref[0] = (proj + bproj_ref[...]).astype(o_ref.dtype)


# ----------------------------------------------------------------------------
# Wrapper: dtype handling, tiling, VMEM budget, pallas_call.
# ----------------------------------------------------------------------------
def cm_attention_block(x, c, params, num_heads, *,
                       compute_dtype=jnp.bfloat16, row_tile=512,
                       vmem_budget_bytes=None):
    B, N, C = x.shape
    H = num_heads
    Dh = C // H
    assert H == 2 and H * Dh == C, (
        "CMAttentionBlock requires num_heads == 2 (dim // num_heads == dim // 2)")
    scale = float(Dh) ** -0.5
    out_dtype = x.dtype

    # ---- Hoisted context projection: once per call, not per row tile ----
    ch = c.reshape(B, H, Dh).astype(jnp.float32)
    wqv = params["wqv"].astype(jnp.float32)
    bqv = params["bqv"].astype(jnp.float32)
    qv = jnp.einsum("bhd,de->bhe", ch, wqv) + bqv          # (B, H, C)
    q = (qv[..., :Dh] * scale).astype(jnp.float32)         # pre-scaled queries
    v1 = qv[..., Dh:].astype(jnp.float32)

    # ---- Weights for the big MXU matmuls (no-op cast if prepared already) ----
    def _to(a, dt):
        return a if a.dtype == dt else a.astype(dt)
    wkv = _to(params["wkv"], compute_dtype)
    wproj = _to(params["wproj"], compute_dtype)
    bkv = _to(params["bkv"], jnp.float32)
    bproj = _to(params["bproj"], jnp.float32)

    # ---- Row tiling ----
    TN = min(row_tile, N)
    if TN < N:
        TN = max(8, (TN // 8) * 8)
    # v7x has 2 TensorCores: make sure small B*N still yields >= 2 grid steps.
    if B * pl.cdiv(N, TN) < 2 and N > 8:
        TN = max(8, ((pl.cdiv(N, 2) + 7) // 8) * 8)

    # ---- VMEM budget / limit heuristic ----
    w_item = jnp.dtype(compute_dtype).itemsize
    x_item = jnp.dtype(x.dtype).itemsize
    o_item = jnp.dtype(out_dtype).itemsize

    def vmem_estimate(tn):
        weights = 3 * C * C * w_item + 12 * C            # wkv + wproj (single-buffered)
        streams = 2 * tn * C * (x_item + o_item)         # double-buffered x / out tiles
        interm = 6 * tn * C * 4                          # kv f32, vs/kd/dv, proj acc
        return weights + streams + interm

    if vmem_budget_bytes is None:
        try:
            vmem_budget_bytes = int(0.8 * pltpu.get_tpu_info().vmem_capacity_bytes)
        except Exception:
            vmem_budget_bytes = 56 * 1024 * 1024         # v7x-safe fallback
    while vmem_estimate(TN) > vmem_budget_bytes and TN > 64:
        TN = max(64, (TN // 16) * 8)                     # ~halve, keep multiple of 8

    grid = (B, pl.cdiv(N, TN))
    vmem_limit = int(min(vmem_budget_bytes,
                         max(32 * 1024 * 1024, int(1.25 * vmem_estimate(TN)))))

    cost = pl.CostEstimate(
        flops=6 * B * N * C * C,                         # kv (4NC^2) + proj (2NC^2)
        transcendentals=2 * B * N,                       # one tanh per row per head
        bytes_accessed=(B * N * C * (x_item + o_item)
                        + 3 * C * C * w_item + 2 * B * C * 4 + 12 * C))

    kernel = functools.partial(_cm_attn_kernel, C=C, Dh=Dh,
                               compute_dtype=compute_dtype)

    def _const_spec(shape, use_buffered):
        ndim = len(shape)
        index_map = lambda b, r: (0,) * ndim
        if use_buffered:
            return pl.BlockSpec(shape, index_map, pipeline_mode=pl.Buffered(1))
        return pl.BlockSpec(shape, index_map)

    def _build_call(use_buffered):
        in_specs = [
            pl.BlockSpec((1, TN, C), lambda b, r: (b, r, 0)),     # x row tile
            pl.BlockSpec((1, H, Dh), lambda b, r: (b, 0, 0)),     # q (pre-scaled)
            pl.BlockSpec((1, H, Dh), lambda b, r: (b, 0, 0)),     # v1
            _const_spec((C, 2 * C), use_buffered),                # wkv
            _const_spec((1, 2 * C), use_buffered),                # bkv
            _const_spec((C, C), use_buffered),                    # wproj
            _const_spec((1, C), use_buffered),                    # bproj
        ]
        return pl.pallas_call(
            kernel,
            out_shape=jax.ShapeDtypeStruct((B, N, C), out_dtype),
            grid=grid,
            in_specs=in_specs,
            out_specs=pl.BlockSpec((1, TN, C), lambda b, r: (b, r, 0)),
            compiler_params=pltpu.CompilerParams(
                dimension_semantics=("parallel", "parallel"),
                vmem_limit_bytes=vmem_limit),
            cost_estimate=cost,
        )

    args = (x, q, v1, wkv, bkv, wproj, bproj)
    try:
        return _build_call(True)(*args)
    except Exception:
        # Fallback: single-buffered weight residency not supported on this jax
        # version -> use default (double-buffered) BlockSpecs.
        return _build_call(False)(*args)


def prepare_params(params, compute_dtype=jnp.bfloat16):
    """Cast the MXU weights once (cache across calls); biases stay f32."""
    return {
        "wqv": params["wqv"].astype(jnp.float32),
        "bqv": params["bqv"].astype(jnp.float32),
        "wkv": params["wkv"].astype(compute_dtype),
        "bkv": params["bkv"].astype(jnp.float32),
        "wproj": params["wproj"].astype(compute_dtype),
        "bproj": params["bproj"].astype(jnp.float32),
    }


# ----------------------------------------------------------------------------
# Pure-JAX reference (mirrors the PyTorch forward exactly) for verification.
# ----------------------------------------------------------------------------
def cm_attention_block_ref(x, c, params, num_heads):
    B, N, C = x.shape
    H = num_heads
    Dh = C // H
    scale = float(Dh) ** -0.5

    ch = c.reshape(B, 1, H, Dh)
    qv = ch @ params["wqv"] + params["bqv"]            # (B, 1, H, C)
    q, v1 = qv[..., :Dh], qv[..., Dh:2 * Dh]           # (B, 1, H, Dh) each

    kv = (x @ params["wkv"] + params["bkv"]).reshape(B, N, 2, H, Dh)
    k, v2 = kv[:, :, 0], kv[:, :, 1]                   # (B, N, H, Dh) each

    q = q * scale
    attn = jnp.einsum("bid,bnjd->bnij", q[:, 0], k)    # (B, N, H, H)
    attn = jax.nn.softmax(attn, axis=-1)
    out1 = jnp.einsum("bnij,bjd->bnid", attn, v1[:, 0])
    out2 = jnp.einsum("bnij,bnjd->bnid", attn, v2)
    y = (out1 + out2).reshape(B, N, C)
    return y @ params["wproj"] + params["bproj"]


# ----------------------------------------------------------------------------
# Deterministic parameter init (nn.Linear shapes, stored transposed (in, out)).
# ----------------------------------------------------------------------------
def init_params(key, dim):
    def linear(k, fan_in, fan_out):
        kw, kb = jax.random.split(k)
        bound = 1.0 / (fan_in ** 0.5)
        w = jax.random.uniform(kw, (fan_in, fan_out), jnp.float32, -bound, bound)
        b = jax.random.uniform(kb, (1, fan_out), jnp.float32, -bound, bound)
        return w, b

    k1, k2, k3 = jax.random.split(key, 3)
    wqv, bqv = linear(k1, dim // 2, dim)        # nn.Linear(dim//2, dim)
    wkv, bkv = linear(k2, dim, 2 * dim)         # nn.Linear(dim, 2*dim)
    wpr, bpr = linear(k3, dim, dim)             # nn.Linear(dim, dim)
    return {"wqv": wqv, "bqv": bqv, "wkv": wkv, "bkv": bkv,
            "wproj": wpr, "bproj": bpr}


if __name__ == "__main__":
    B, N, dim, num_heads = 2, 8, 32, 2

    key = jax.random.PRNGKey(0)
    kx, kc, kp = jax.random.split(key, 3)
    x = jax.random.normal(kx, (B, N, dim), jnp.float32)
    c = jax.random.normal(kc, (B, dim), jnp.float32)
    params = init_params(kp, dim)

    ref = cm_attention_block_ref(x, c, params, num_heads)

    # f32 MXU-operand path: near-exact parity with the PyTorch reference.
    out_f32 = jax.block_until_ready(
        cm_attention_block(x, c, params, num_heads, compute_dtype=jnp.float32))
    assert out_f32.shape == (B, N, dim)
    assert jnp.allclose(out_f32, ref, atol=5e-3, rtol=5e-3), "f32 kernel mismatch"

    # Default path: bf16 MXU operands (weights cast once), f32 accumulation.
    params_bf16 = prepare_params(params, jnp.bfloat16)
    out_bf16 = jax.block_until_ready(
        cm_attention_block(x, c, params_bf16, num_heads))
    assert out_bf16.shape == (B, N, dim)
    assert jnp.allclose(out_bf16, ref, atol=2.5e-1, rtol=2.5e-1), "bf16 kernel mismatch"

    print("KERNEL_OK")
</pallas_src>

<mosaic_0001>
module attributes {stable_mosaic.version = 11 : i64} {
  func.func @_cm_attn_kernel(%arg0: i32, %arg1: i32, %arg2: memref<1x8x32xf32, #tpu.memory_space<vmem>>, %arg3: memref<1x2x16xf32, #tpu.memory_space<vmem>>, %arg4: memref<1x2x16xf32, #tpu.memory_space<vmem>>, %arg5: memref<32x64xf32, #tpu.memory_space<vmem>>, %arg6: memref<1x64xf32, #tpu.memory_space<vmem>>, %arg7: memref<32x32xf32, #tpu.memory_space<vmem>>, %arg8: memref<1x32xf32, #tpu.memory_space<vmem>>, %arg9: memref<1x8x32xf32, #tpu.memory_space<vmem>>) attributes {dimension_semantics = [#tpu.dimension_semantics<parallel>, #tpu.dimension_semantics<parallel>], iteration_bounds = array<i64: 2, 1>, scalar_prefetch = 0 : i64, scratch_operands = 0 : i64, tpu.core_type = #tpu.core_type<tc>, window_params = [{transform_indices = @transform_0, window_bounds = array<i64: 1, 8, 32>}, {transform_indices = @transform_1, window_bounds = array<i64: 1, 2, 16>}, {transform_indices = @transform_2, window_bounds = array<i64: 1, 2, 16>}, {pipeline_mode = #tpu.pipeline_mode<synchronous>, transform_indices = @transform_3, window_bounds = array<i64: 32, 64>}, {pipeline_mode = #tpu.pipeline_mode<synchronous>, transform_indices = @transform_4, window_bounds = array<i64: 1, 64>}, {pipeline_mode = #tpu.pipeline_mode<synchronous>, transform_indices = @transform_5, window_bounds = array<i64: 32, 32>}, {pipeline_mode = #tpu.pipeline_mode<synchronous>, transform_indices = @transform_6, window_bounds = array<i64: 1, 32>}, {transform_indices = @transform_7, window_bounds = array<i64: 1, 8, 32>}]} {
    %c0 = arith.constant 0 : index
    %c0_0 = arith.constant 0 : index
    %c0_1 = arith.constant 0 : index
    %0 = vector.load %arg2[%c0, %c0_0, %c0_1] : memref<1x8x32xf32, #tpu.memory_space<vmem>>, vector<1x8x32xf32>
    %1 = vector.shape_cast %0 : vector<1x8x32xf32> to vector<8x32xf32>
    %c0_2 = arith.constant 0 : index
    %c0_3 = arith.constant 0 : index
    %c0_4 = arith.constant 0 : index
    %2 = vector.load %arg3[%c0_2, %c0_3, %c0_4] : memref<1x2x16xf32, #tpu.memory_space<vmem>>, vector<1x2x16xf32>
    %3 = vector.shape_cast %2 : vector<1x2x16xf32> to vector<2x16xf32>
    %c0_5 = arith.constant 0 : index
    %c0_6 = arith.constant 0 : index
    %c0_7 = arith.constant 0 : index
    %4 = vector.load %arg4[%c0_5, %c0_6, %c0_7] : memref<1x2x16xf32, #tpu.memory_space<vmem>>, vector<1x2x16xf32>
    %5 = vector.shape_cast %4 : vector<1x2x16xf32> to vector<2x16xf32>
    %c0_8 = arith.constant 0 : index
    %c0_9 = arith.constant 0 : index
    %6 = vector.load %arg5[%c0_8, %c0_9] : memref<32x64xf32, #tpu.memory_space<vmem>>, vector<32x64xf32>
    %cst = arith.constant dense<0.000000e+00> : vector<8x64xf32>
    %7 = tpu.matmul %1, %6, %cst {dimension_numbers = #tpu.dot_dimension_numbers<[1], [0], [0], [1], [0, 0, 1, 1], [], []>} : vector<8x32xf32>, vector<32x64xf32>, vector<8x64xf32> -> vector<8x64xf32>
    %c0_10 = arith.constant 0 : index
    %c0_11 = arith.constant 0 : index
    %8 = vector.load %arg6[%c0_10, %c0_11] : memref<1x64xf32, #tpu.memory_space<vmem>>, vector<1x64xf32>
    %9 = vector.broadcast %8 : vector<1x64xf32> to vector<8x64xf32>
    %10 = arith.addf %7, %9 : vector<8x64xf32>
    %11 = vector.extract_strided_slice %10 {offsets = [0, 0], sizes = [8, 16], strides = [1, 1]} : vector<8x64xf32> to vector<8x16xf32>
    %12 = vector.extract_strided_slice %10 {offsets = [0, 16], sizes = [8, 16], strides = [1, 1]} : vector<8x64xf32> to vector<8x16xf32>
    %13 = vector.extract_strided_slice %5 {offsets = [0, 0], sizes = [1, 16], strides = [1, 1]} : vector<2x16xf32> to vector<1x16xf32>
    %14 = vector.extract_strided_slice %10 {offsets = [0, 32], sizes = [8, 16], strides = [1, 1]} : vector<8x64xf32> to vector<8x16xf32>
    %15 = vector.broadcast %13 : vector<1x16xf32> to vector<8x16xf32>
    %16 = arith.addf %15, %14 : vector<8x16xf32>
    %17 = vector.extract_strided_slice %5 {offsets = [1, 0], sizes = [1, 16], strides = [1, 1]} : vector<2x16xf32> to vector<1x16xf32>
    %18 = vector.extract_strided_slice %10 {offsets = [0, 48], sizes = [8, 16], strides = [1, 1]} : vector<8x64xf32> to vector<8x16xf32>
    %19 = vector.broadcast %17 : vector<1x16xf32> to vector<8x16xf32>
    %20 = arith.addf %19, %18 : vector<8x16xf32>
    %21 = arith.subf %11, %12 : vector<8x16xf32>
    %22 = arith.subf %16, %20 : vector<8x16xf32>
    %23 = vector.extract_strided_slice %3 {offsets = [0, 0], sizes = [1, 16], strides = [1, 1]} : vector<2x16xf32> to vector<1x16xf32>
    %24 = vector.broadcast %23 : vector<1x16xf32> to vector<8x16xf32>
    %25 = arith.mulf %21, %24 : vector<8x16xf32>
    %cst_12 = arith.constant dense<0.000000e+00> : vector<8xf32>
    %26 = vector.multi_reduction <add>, %25, %cst_12 [1] : vector<8x16xf32> to vector<8xf32>
    %27 = vector.shape_cast %26 : vector<8xf32> to vector<8x1xf32>
    %cst_13 = arith.constant 5.000000e-01 : f32
    %28 = vector.broadcast %cst_13 : f32 to vector<8x1xf32>
    %29 = arith.mulf %28, %27 : vector<8x1xf32>
    %30 = math.tanh %29 : vector<8x1xf32>
    %cst_14 = arith.constant 1.000000e+00 : f32
    %31 = vector.broadcast %cst_14 : f32 to vector<8x1xf32>
    %32 = arith.addf %30, %31 : vector<8x1xf32>
    %cst_15 = arith.constant 5.000000e-01 : f32
    %33 = vector.broadcast %cst_15 : f32 to vector<8x1xf32>
    %34 = arith.mulf %33, %32 : vector<8x1xf32>
    %35 = vector.broadcast %34 : vector<8x1xf32> to vector<8x16xf32>
    %36 = arith.mulf %35, %22 : vector<8x16xf32>
    %37 = arith.addf %36, %20 : vector<8x16xf32>
    %c0_16 = arith.constant 0 : index
    %c0_17 = arith.constant 0 : index
    %38 = vector.load %arg7[%c0_16, %c0_17] : memref<32x32xf32, #tpu.memory_space<vmem>>, vector<16x32xf32>
    %cst_18 = arith.constant dense<0.000000e+00> : vector<8x32xf32>
    %39 = tpu.matmul %37, %38, %cst_18 {dimension_numbers = #tpu.dot_dimension_numbers<[1], [0], [0], [1], [0, 0, 1, 1], [], []>} : vector<8x16xf32>, vector<16x32xf32>, vector<8x32xf32> -> vector<8x32xf32>
    %40 = vector.extract_strided_slice %3 {offsets = [1, 0], sizes = [1, 16], strides = [1, 1]} : vector<2x16xf32> to vector<1x16xf32>
    %41 = vector.broadcast %40 : vector<1x16xf32> to vector<8x16xf32>
    %42 = arith.mulf %21, %41 : vector<8x16xf32>
    %cst_19 = arith.constant dense<0.000000e+00> : vector<8xf32>
    %43 = vector.multi_reduction <add>, %42, %cst_19 [1] : vector<8x16xf32> to vector<8xf32>
    %44 = vector.shape_cast %43 : vector<8xf32> to vector<8x1xf32>
    %cst_20 = arith.constant 5.000000e-01 : f32
    %45 = vector.broadcast %cst_20 : f32 to vector<8x1xf32>
    %46 = arith.mulf %45, %44 : vector<8x1xf32>
    %47 = math.tanh %46 : vector<8x1xf32>
    %cst_21 = arith.constant 1.000000e+00 : f32
    %48 = vector.broadcast %cst_21 : f32 to vector<8x1xf32>
    %49 = arith.addf %47, %48 : vector<8x1xf32>
    %cst_22 = arith.constant 5.000000e-01 : f32
    %50 = vector.broadcast %cst_22 : f32 to vector<8x1xf32>
    %51 = arith.mulf %50, %49 : vector<8x1xf32>
    %52 = vector.broadcast %51 : vector<8x1xf32> to vector<8x16xf32>
    %53 = arith.mulf %52, %22 : vector<8x16xf32>
    %54 = arith.addf %53, %20 : vector<8x16xf32>
    %c16 = arith.constant 16 : index
    %c0_23 = arith.constant 0 : index
    %55 = vector.load %arg7[%c16, %c0_23] : memref<32x32xf32, #tpu.memory_space<vmem>>, vector<16x32xf32>
    %cst_24 = arith.constant dense<0.000000e+00> : vector<8x32xf32>
    %56 = tpu.matmul %54, %55, %cst_24 {dimension_numbers = #tpu.dot_dimension_numbers<[1], [0], [0], [1], [0, 0, 1, 1], [], []>} : vector<8x16xf32>, vector<16x32xf32>, vector<8x32xf32> -> vector<8x32xf32>
    %57 = arith.addf %39, %56 : vector<8x32xf32>
    %c0_25 = arith.constant 0 : index
    %c0_26 = arith.constant 0 : index
    %58 = vector.load %arg8[%c0_25, %c0_26] : memref<1x32xf32, #tpu.memory_space<vmem>>, vector<1x32xf32>
    %59 = vector.broadcast %58 : vector<1x32xf32> to vector<8x32xf32>
    %60 = arith.addf %57, %59 : vector<8x32xf32>
    %c0_27 = arith.constant 0 : index
    %c0_28 = arith.constant 0 : index
    %c0_29 = arith.constant 0 : index
    %61 = vector.load %arg9[%c0_27, %c0_28, %c0_29] : memref<1x8x32xf32, #tpu.memory_space<vmem>>, vector<1x8x32xf32>
    %62 = vector.shape_cast %61 : vector<1x8x32xf32> to vector<8x32xf32>
    %63 = vector.shape_cast %60 : vector<8x32xf32> to vector<1x8x32xf32>
    tpu.vector_store %arg9[%c0_27, %c0_28, %c0_29], %63 {strides = array<i32>} : memref<1x8x32xf32, #tpu.memory_space<vmem>>, vector<1x8x32xf32>,
    return
  }
  func.func @transform_0(%arg0: i32, %arg1: i32) -> (i32, i32, i32) {
    %c0_i32 = arith.constant 0 : i32
    %c0_i32_0 = arith.constant 0 : i32
    return %arg0, %arg1, %c0_i32 : i32, i32, i32
  }
  func.func @transform_1(%arg0: i32, %arg1: i32) -> (i32, i32, i32) {
    %c0_i32 = arith.constant 0 : i32
    %c0_i32_0 = arith.constant 0 : i32
    %c0_i32_1 = arith.constant 0 : i32
    return %arg0, %c0_i32, %c0_i32_0 : i32, i32, i32
  }
  func.func @transform_2(%arg0: i32, %arg1: i32) -> (i32, i32, i32) {
    %c0_i32 = arith.constant 0 : i32
    %c0_i32_0 = arith.constant 0 : i32
    %c0_i32_1 = arith.constant 0 : i32
    return %arg0, %c0_i32, %c0_i32_0 : i32, i32, i32
  }
  func.func @transform_3(%arg0: i32, %arg1: i32) -> (i32, i32) {
    %c0_i32 = arith.constant 0 : i32
    %c0_i32_0 = arith.constant 0 : i32
    %c0_i32_1 = arith.constant 0 : i32
    return %c0_i32, %c0_i32_0 : i32, i32
  }
  func.func @transform_4(%arg0: i32, %arg1: i32) -> (i32, i32) {
    %c0_i32 = arith.constant 0 : i32
    %c0_i32_0 = arith.constant 0 : i32
    %c0_i32_1 = arith.constant 0 : i32
    return %c0_i32, %c0_i32_0 : i32, i32
  }
  func.func @transform_5(%arg0: i32, %arg1: i32) -> (i32, i32) {
    %c0_i32 = arith.constant 0 : i32
    %c0_i32_0 = arith.constant 0 : i32
    %c0_i32_1 = arith.constant 0 : i32
    return %c0_i32, %c0_i32_0 : i32, i32
  }
  func.func @transform_6(%arg0: i32, %arg1: i32) -> (i32, i32) {
    %c0_i32 = arith.constant 0 : i32
    %c0_i32_0 = arith.constant 0 : i32
    %c0_i32_1 = arith.constant 0 : i32
    return %c0_i32, %c0_i32_0 : i32, i32
  }
  func.func @transform_7(%arg0: i32, %arg1: i32) -> (i32, i32, i32) {
    %c0_i32 = arith.constant 0 : i32
    %c0_i32_0 = arith.constant 0 : i32
    return %arg0, %arg1, %c0_i32 : i32, i32, i32
  }
}

module attributes {stable_mosaic.version = 11 : i64} {
  func.func @_cm_attn_kernel(%arg0: i32, %arg1: i32, %arg2: memref<1x8x32xf32, #tpu.memory_space<vmem>>, %arg3: memref<1x2x16xf32, #tpu.memory_space<vmem>>, %arg4: memref<1x2x16xf32, #tpu.memory_space<vmem>>, %arg5: memref<32x64xf32, #tpu.memory_space<vmem>>, %arg6: memref<1x64xf32, #tpu.memory_space<vmem>>, %arg7: memref<32x32xf32, #tpu.memory_space<vmem>>, %arg8: memref<1x32xf32, #tpu.memory_space<vmem>>, %arg9: memref<1x8x32xf32, #tpu.memory_space<vmem>>) attributes {dimension_semantics = [#tpu.dimension_semantics<parallel>, #tpu.dimension_semantics<parallel>], iteration_bounds = array<i64: 2, 1>, scalar_prefetch = 0 : i64, scratch_operands = 0 : i64, tpu.core_type = #tpu.core_type<tc>, window_params = [{transform_indices = @transform_0, window_bounds = array<i64: 1, 8, 32>}, {transform_indices = @transform_1, window_bounds = array<i64: 1, 2, 16>}, {transform_indices = @transform_2, window_bounds = array<i64: 1, 2, 16>}, {pipeline_mode = #tpu.pipeline_mode<synchronous>, transform_indices = @transform_3, window_bounds = array<i64: 32, 64>}, {pipeline_mode = #tpu.pipeline_mode<synchronous>, transform_indices = @transform_4, window_bounds = array<i64: 1, 64>}, {pipeline_mode = #tpu.pipeline_mode<synchronous>, transform_indices = @transform_5, window_bounds = array<i64: 32, 32>}, {pipeline_mode = #tpu.pipeline_mode<synchronous>, transform_indices = @transform_6, window_bounds = array<i64: 1, 32>}, {transform_indices = @transform_7, window_bounds = array<i64: 1, 8, 32>}]} {
    %c0 = arith.constant 0 : index
    %c0_0 = arith.constant 0 : index
    %c0_1 = arith.constant 0 : index
    %0 = vector.load %arg2[%c0, %c0_0, %c0_1] : memref<1x8x32xf32, #tpu.memory_space<vmem>>, vector<1x8x32xf32>
    %1 = vector.shape_cast %0 : vector<1x8x32xf32> to vector<8x32xf32>
    %c0_2 = arith.constant 0 : index
    %c0_3 = arith.constant 0 : index
    %c0_4 = arith.constant 0 : index
    %2 = vector.load %arg3[%c0_2, %c0_3, %c0_4] : memref<1x2x16xf32, #tpu.memory_space<vmem>>, vector<1x2x16xf32>
    %3 = vector.shape_cast %2 : vector<1x2x16xf32> to vector<2x16xf32>
    %c0_5 = arith.constant 0 : index
    %c0_6 = arith.constant 0 : index
    %c0_7 = arith.constant 0 : index
    %4 = vector.load %arg4[%c0_5, %c0_6, %c0_7] : memref<1x2x16xf32, #tpu.memory_space<vmem>>, vector<1x2x16xf32>
    %5 = vector.shape_cast %4 : vector<1x2x16xf32> to vector<2x16xf32>
    %c0_8 = arith.constant 0 : index
    %c0_9 = arith.constant 0 : index
    %6 = vector.load %arg5[%c0_8, %c0_9] : memref<32x64xf32, #tpu.memory_space<vmem>>, vector<32x64xf32>
    %cst = arith.constant dense<0.000000e+00> : vector<8x64xf32>
    %7 = tpu.matmul %1, %6, %cst {dimension_numbers = #tpu.dot_dimension_numbers<[1], [0], [0], [1], [0, 0, 1, 1], [], []>} : vector<8x32xf32>, vector<32x64xf32>, vector<8x64xf32> -> vector<8x64xf32>
    %c0_10 = arith.constant 0 : index
    %c0_11 = arith.constant 0 : index
    %8 = vector.load %arg6[%c0_10, %c0_11] : memref<1x64xf32, #tpu.memory_space<vmem>>, vector<1x64xf32>
    %9 = vector.broadcast %8 : vector<1x64xf32> to vector<8x64xf32>
    %10 = arith.addf %7, %9 : vector<8x64xf32>
    %11 = vector.extract_strided_slice %10 {offsets = [0, 0], sizes = [8, 16], strides = [1, 1]} : vector<8x64xf32> to vector<8x16xf32>
    %12 = vector.extract_strided_slice %10 {offsets = [0, 16], sizes = [8, 16], strides = [1, 1]} : vector<8x64xf32> to vector<8x16xf32>
    %13 = vector.extract_strided_slice %5 {offsets = [0, 0], sizes = [1, 16], strides = [1, 1]} : vector<2x16xf32> to vector<1x16xf32>
    %14 = vector.extract_strided_slice %10 {offsets = [0, 32], sizes = [8, 16], strides = [1, 1]} : vector<8x64xf32> to vector<8x16xf32>
    %15 = vector.broadcast %13 : vector<1x16xf32> to vector<8x16xf32>
    %16 = arith.addf %15, %14 : vector<8x16xf32>
    %17 = vector.extract_strided_slice %5 {offsets = [1, 0], sizes = [1, 16], strides = [1, 1]} : vector<2x16xf32> to vector<1x16xf32>
    %18 = vector.extract_strided_slice %10 {offsets = [0, 48], sizes = [8, 16], strides = [1, 1]} : vector<8x64xf32> to vector<8x16xf32>
    %19 = vector.broadcast %17 : vector<1x16xf32> to vector<8x16xf32>
    %20 = arith.addf %19, %18 : vector<8x16xf32>
    %21 = arith.subf %11, %12 : vector<8x16xf32>
    %22 = arith.subf %16, %20 : vector<8x16xf32>
    %23 = vector.extract_strided_slice %3 {offsets = [0, 0], sizes = [1, 16], strides = [1, 1]} : vector<2x16xf32> to vector<1x16xf32>
    %24 = vector.broadcast %23 : vector<1x16xf32> to vector<8x16xf32>
    %25 = arith.mulf %21, %24 : vector<8x16xf32>
    %cst_12 = arith.constant dense<0.000000e+00> : vector<8xf32>
    %26 = vector.multi_reduction <add>, %25, %cst_12 [1] : vector<8x16xf32> to vector<8xf32>
    %27 = vector.shape_cast %26 : vector<8xf32> to vector<8x1xf32>
    %cst_13 = arith.constant 5.000000e-01 : f32
    %28 = vector.broadcast %cst_13 : f32 to vector<8x1xf32>
    %29 = arith.mulf %28, %27 : vector<8x1xf32>
    %30 = math.tanh %29 : vector<8x1xf32>
    %cst_14 = arith.constant 1.000000e+00 : f32
    %31 = vector.broadcast %cst_14 : f32 to vector<8x1xf32>
    %32 = arith.addf %30, %31 : vector<8x1xf32>
    %cst_15 = arith.constant 5.000000e-01 : f32
    %33 = vector.broadcast %cst_15 : f32 to vector<8x1xf32>
    %34 = arith.mulf %33, %32 : vector<8x1xf32>
    %35 = vector.broadcast %34 : vector<8x1xf32> to vector<8x16xf32>
    %36 = arith.mulf %35, %22 : vector<8x16xf32>
    %37 = arith.addf %36, %20 : vector<8x16xf32>
    %c0_16 = arith.constant 0 : index
    %c0_17 = arith.constant 0 : index
    %38 = vector.load %arg7[%c0_16, %c0_17] : memref<32x32xf32, #tpu.memory_space<vmem>>, vector<16x32xf32>
    %cst_18 = arith.constant dense<0.000000e+00> : vector<8x32xf32>
    %39 = tpu.matmul %37, %38, %cst_18 {dimension_numbers = #tpu.dot_dimension_numbers<[1], [0], [0], [1], [0, 0, 1, 1], [], []>} : vector<8x16xf32>, vector<16x32xf32>, vector<8x32xf32> -> vector<8x32xf32>
    %40 = vector.extract_strided_slice %3 {offsets = [1, 0], sizes = [1, 16], strides = [1, 1]} : vector<2x16xf32> to vector<1x16xf32>
    %41 = vector.broadcast %40 : vector<1x16xf32> to vector<8x16xf32>
    %42 = arith.mulf %21, %41 : vector<8x16xf32>
    %cst_19 = arith.constant dense<0.000000e+00> : vector<8xf32>
    %43 = vector.multi_reduction <add>, %42, %cst_19 [1] : vector<8x16xf32> to vector<8xf32>
    %44 = vector.shape_cast %43 : vector<8xf32> to vector<8x1xf32>
    %cst_20 = arith.constant 5.000000e-01 : f32
    %45 = vector.broadcast %cst_20 : f32 to vector<8x1xf32>
    %46 = arith.mulf %45, %44 : vector<8x1xf32>
    %47 = math.tanh %46 : vector<8x1xf32>
    %cst_21 = arith.constant 1.000000e+00 : f32
    %48 = vector.broadcast %cst_21 : f32 to vector<8x1xf32>
    %49 = arith.addf %47, %48 : vector<8x1xf32>
    %cst_22 = arith.constant 5.000000e-01 : f32
    %50 = vector.broadcast %cst_22 : f32 to vector<8x1xf32>
    %51 = arith.mulf %50, %49 : vector<8x1xf32>
    %52 = vector.broadcast %51 : vector<8x1xf32> to vector<8x16xf32>
    %53 = arith.mulf %52, %22 : vector<8x16xf32>
    %54 = arith.addf %53, %20 : vector<8x16xf32>
    %c16 = arith.constant 16 : index
    %c0_23 = arith.constant 0 : index
    %55 = vector.load %arg7[%c16, %c0_23] : memref<32x32xf32, #tpu.memory_space<vmem>>, vector<16x32xf32>
    %cst_24 = arith.constant dense<0.000000e+00> : vector<8x32xf32>
    %56 = tpu.matmul %54, %55, %cst_24 {dimension_numbers = #tpu.dot_dimension_numbers<[1], [0], [0], [1], [0, 0, 1, 1], [], []>} : vector<8x16xf32>, vector<16x32xf32>, vector<8x32xf32> -> vector<8x32xf32>
    %57 = arith.addf %39, %56 : vector<8x32xf32>
    %c0_25 = arith.constant 0 : index
    %c0_26 = arith.constant 0 : index
    %58 = vector.load %arg8[%c0_25, %c0_26] : memref<1x32xf32, #tpu.memory_space<vmem>>, vector<1x32xf32>
    %59 = vector.broadcast %58 : vector<1x32xf32> to vector<8x32xf32>
    %60 = arith.addf %57, %59 : vector<8x32xf32>
    %c0_27 = arith.constant 0 : index
    %c0_28 = arith.constant 0 : index
    %c0_29 = arith.constant 0 : index
    %61 = vector.load %arg9[%c0_27, %c0_28, %c0_29] : memref<1x8x32xf32, #tpu.memory_space<vmem>>, vector<1x8x32xf32>
    %62 = vector.shape_cast %61 : vector<1x8x32xf32> to vector<8x32xf32>
    %63 = vector.shape_cast %60 : vector<8x32xf32> to vector<1x8x32xf32>
    tpu.vector_store %arg9[%c0_27, %c0_28, %c0_29], %63 {strides = array<i32>} : memref<1x8x32xf32, #tpu.memory_space<vmem>>, vector<1x8x32xf32>,
    return
  }
  func.func @transform_0(%arg0: i32, %arg1: i32) -> (i32, i32, i32) {
    %c0_i32 = arith.constant 0 : i32
    %c0_i32_0 = arith.constant 0 : i32
    return %arg0, %arg1, %c0_i32 : i32, i32, i32
  }
  func.func @transform_1(%arg0: i32, %arg1: i32) -> (i32, i32, i32) {
    %c0_i32 = arith.constant 0 : i32
    %c0_i32_0 = arith.constant 0 : i32
    %c0_i32_1 = arith.constant 0 : i32
    return %arg0, %c0_i32, %c0_i32_0 : i32, i32, i32
  }
  func.func @transform_2(%arg0: i32, %arg1: i32) -> (i32, i32, i32) {
    %c0_i32 = arith.constant 0 : i32
    %c0_i32_0 = arith.constant 0 : i32
    %c0_i32_1 = arith.constant 0 : i32
    return %arg0, %c0_i32, %c0_i32_0 : i32, i32, i32
  }
  func.func @transform_3(%arg0: i32, %arg1: i32) -> (i32, i32) {
    %c0_i32 = arith.constant 0 : i32
    %c0_i32_0 = arith.constant 0 : i32
    %c0_i32_1 = arith.constant 0 : i32
    return %c0_i32, %c0_i32_0 : i32, i32
  }
  func.func @transform_4(%arg0: i32, %arg1: i32) -> (i32, i32) {
    %c0_i32 = arith.constant 0 : i32
    %c0_i32_0 = arith.constant 0 : i32
    %c0_i32_1 = arith.constant 0 : i32
    return %c0_i32, %c0_i32_0 : i32, i32
  }
  func.func @transform_5(%arg0: i32, %arg1: i32) -> (i32, i32) {
    %c0_i32 = arith.constant 0 : i32
    %c0_i32_0 = arith.constant 0 : i32
    %c0_i32_1 = arith.constant 0 : i32
    return %c0_i32, %c0_i32_0 : i32, i32
  }
  func.func @transform_6(%arg0: i32, %arg1: i32) -> (i32, i32) {
    %c0_i32 = arith.constant 0 : i32
    %c0_i32_0 = arith.constant 0 : i32
    %c0_i32_1 = arith.constant 0 : i32
    return %c0_i32, %c0_i32_0 : i32, i32
  }
  func.func @transform_7(%arg0: i32, %arg1: i32) -> (i32, i32, i32) {
    %c0_i32 = arith.constant 0 : i32
    %c0_i32_0 = arith.constant 0 : i32
    return %arg0, %arg1, %c0_i32 : i32, i32, i32
  }
}

</mosaic_0001>

<bundles_post_ra>
// kernel: tpu_custom_call.1
= control target key start
LH: loop header
LB: loop body
LE: loop exit
PB: predicated region body
PF: predicated region fallthrough
CT: control target
= control target key end

     0   :  { %s1331_s0 = inlined_call_operand.hbm [shape: f32[2,8,32], index: 0, kind: input, shape index: {}]   ;;  %s1332_s1 = inlined_call_operand.hbm [shape: f32[2,2,16], index: 1, kind: input, shape index: {}]   ;;  %s1333_s2 = inlined_call_operand.hbm [shape: f32[2,2,16], index: 2, kind: input, shape index: {}]   ;;  %s1334_s3 = inlined_call_operand.hbm [shape: f32[32,64], index: 3, kind: input, shape index: {}]   ;;  %s1335_s4 = inlined_call_operand.vmem [shape: f32[1,64], index: 4, kind: input, shape index: {}]   ;;  %s1336_s5 = inlined_call_operand.hbm [shape: f32[32,32], index: 5, kind: input, shape index: {}]   ;;  %s1337_s6 = inlined_call_operand.vmem [shape: f32[1,32], index: 6, kind: input, shape index: {}]   ;;  %s1338_s7 = inlined_call_operand.hbm [shape: f32[2,8,32], index: 7, kind: output, shape index: {}]  }
   0x1   :  { %1349 = sst [smem:[#allocation23_spill]] %s1332_s1 }
   0x2   :  { %1350 = sst [smem:[#allocation24_spill]] %s1333_s2 }
   0x3   :  { %1351 = sst [smem:[#allocation25_spill]] %s1334_s3 }
   0x4   :  { %1352 = sst [smem:[#allocation26_spill]] %s1337_s6 }
   0x5   :  { %12 = vsyncpa [#allocation3], 0 }
   0x6   :  { %14 = vsyncpa [#allocation3 + $0x1], 0 }
   0x7   :  { %15 = vsyncpa [#allocation6], 0 }
   0x8   :  { %17 = vsyncpa [#allocation6 + $0x1], 0 }
   0x9   :  { %18 = vsyncpa [#allocation9], 0 }
   0xa   :  { %19 = vsyncpa [#allocation4], 0 }
   0xb   :  { %21 = vsyncpa [#allocation4 + $0x1], 0  ;;  %s1129_s24 = smov 0   ;;  %s1131_s25 = smov 0  }
   0xc   :  { %s1133_s26 = smov 0   ;;  %s1135_s27 = smov 0  }
   0xd   :  { %s1137_s28 = smov 0   ;;  %s1139_s29 = smov 0  }
   0xe LB: > { %1353 = sst [smem:[#allocation16_spill]] %s1060_s24  ;;  %s1160_s30 = sadd.s32 4294967295, %s1080_s29   ;;  %s1080_s29 = sphi %s1139_s29, %s27_s29   ;;  %s1076_s28 = sphi %s1137_s28, %s1383_s28   ;;  %s1072_s27 = sphi %s1135_s27, %s1382_s27   ;;  %s1068_s26 = sphi %s1133_s26, %s1378_s26   ;;  %s1064_s25 = sphi %s1131_s25, %s1381_s25   ;;  %s1060_s24 = sphi %s1129_s24, %s1380_s24  }
   0xf   : > { %1354 = sst [smem:[#allocation17_spill]] %s1068_s26  ;;  %p712_p0 = scmp.ge.s32.totalorder %s1080_s29, 1 }
  0x10   : > { %1355 = sst [smem:[#allocation18_spill]] %s1080_s29  ;;  %p62_p1 = scmp.eq.s32.totalorder %s1160_s30, 0 }
  0x11   : > { %p236_p2 = scmp.lt.s32.totalorder %s1080_s29, 3  ;;  %s1356_s3 = sld [smem:[#allocation25_spill]] }
  0x12   : > { %s1082_s12 = smov [#allocation8]   ;;  %s1339_s15 = smov 128  }
  0x13   : > { %p1168_p3 = pnand %p712_p0, %p236_p2  ;;  %s249_s13 = sshll.u32 %s1082_s12, 4  ;;  %s250_s13 = int_to_ptr.vmem [resolvable:$true] %s249_s13 }
  0x14   : > { %s1340_s16 = smov 8   ;;  %s711_s17 = sadd.s32 4294967294, %s1080_s29  }
  0x15   : > { %p752_p4 = pneg %p1168_p3  ;;  %s39_s18 = sadd.s32 1, %s1076_s28 }
  0x16   : > { %s48_s19 = sadd.s32 1, %s1068_s26  ;;  %p41_p7 = scmp.ge.s32.totalorder %s39_s18, 2 }
  0x17   : > { %s247_s10 = sshll.u32 %s1356_s3, 4  ;;  %p1176_p5 = pnand %p752_p4, %p62_p1  ;;  %s248_s10 = int_to_ptr.hbm [resolvable:$true] %s247_s10 }
  0x18   : > { %p55_p8 = scmp.ne.s32.totalorder %s1068_s26, %s1064_s25  ;;  %p56_p9 = scmp.eq.s32.totalorder %s1080_s29, 0 }
  0x19   : > { %755 = dma.hbm_to_vmem [thread:$0]  (!%p1176_p5), %s248_s10, 512, %s250_s13, [#allocation9], %s1339_s15, %s1339_s15, %s1340_s16  }
  0x1a   : > { %p61_p10 = scmp.ne.s32.totalorder %s1064_s25, %s1060_s24  ;;  %s1385_s18 = smov (%p41_p7, %s39_s18), 0 }
  0x1b   : > { %1359 = sst [smem:[#allocation19_spill]] %s1385_s18  ;;  %p57_p11 = por %p56_p9, %p55_p8 }
  0x1c   : > { %p1198_p12 = por %p62_p1, %p61_p10  ;;  %s43_s21 = ssub.s32 %s1076_s28, %s1385_s18 }
  0x1d   : > { %p223_p13 = scmp.eq.s32.totalorder %s1160_s30, 1  ;;  %p46_p0 = scmp.eq.s32.totalorder %s43_s21, 0 }
  0x1e   : > { %p229_p2 = scmp.eq.s32.totalorder %s711_s17, 1  ;;  %p775_p6 = scmp.lt.s32.totalorder %s1080_s29, 2 }
  0x1f   : > { %p1205_p4 = por %p223_p13, %p55_p8  ;;  %s1218_s9 = sand.u32 1, %s1068_s26  }
  0x20   : > { %s1211_s23 = scalar_select %p46_p0, %s1068_s26, %s48_s19  }
  0x21   : > { %s1361_s22 = scalar_select %p1205_p4, 1, 0 }
  0x22   : > { %1363 = sst [smem:[#allocation21_spill]] %s1211_s23  ;;  %p1213_p7 = por %p229_p2, %p61_p10 }
  0x23   : > { %1362 = sst [smem:[#allocation20_spill]] %s1361_s22  ;;  %p1220_p9 = pnand %p775_p6, %p57_p11 }
  0x24   : > { %s1364_s8 = scalar_select %p1213_p7, 1, 0 }
  0x25   : > { %s303_s12 = sand.u32 1, %s1080_s29   ;;  %s718_s13 = sshll.u32 %s1218_s9, 1 }
  0x26   : > { %1365 = sst [smem:[#allocation22_spill]] %s1364_s8  ;;  %s719_s17 = sshll.u32 %s1076_s28, 1 }
  0x27   : > { %s307_s21 = scalar_lea.vmem [#allocation5], %s718_s13  ;;  %s1367_s1 = sld [smem:[#allocation23_spill]] }
  0x28   : > { %s315_s19 = sshll.u32 %s307_s21, 4  ;;  %s1368_s2 = sld [smem:[#allocation24_spill]]  ;;  %s316_s19 = int_to_ptr.vmem [resolvable:$true] %s315_s19 }
  0x29   : > { %s304_s24 = scalar_lea.sflag [#allocation6], %s303_s12  ;;  %s264_s21 = sshll.u32 %s1336_s5, 4  ;;  %s265_s21 = int_to_ptr.hbm [resolvable:$true] %s264_s21 }
  0x2a   : > { %s1085_s6 = smov [#allocation10]   ;;  %s1370_s16 = smov 128  }
  0x2b   : > { %s266_s15 = sshll.u32 %s1085_s6, 4  ;;  %s716_s26 = sshll.u32 %s1218_s9, 3  ;;  %s267_s15 = int_to_ptr.vmem [resolvable:$true] %s266_s15 }
  0x2c   : > { %s717_s23 = sshll.u32 %s1076_s28, 3  ;;  %s287_s29 = scalar_lea.vmem [#allocation2], %s716_s26 }
  0x2d   : > { %s311_s3 = scalar_lea.hbm %s1367_s1, %s719_s17  ;;  %s296_s22 = sshll.u32 %s287_s29, 4  ;;  %s297_s22 = int_to_ptr.vmem [resolvable:$true] %s296_s22 }
  0x2e   : > { %s313_s18 = sshll.u32 %s311_s3, 4  ;;  %s330_s8 = scalar_lea.hbm %s1368_s2, %s719_s17  ;;  %s314_s18 = int_to_ptr.hbm [resolvable:$true] %s313_s18 }
  0x2f   : > { %765 = dma.hbm_to_vmem [thread:$0]  (!%p1220_p9), %s314_s18, 32, %s316_s19, %s304_s24  }
  0x30   : > { %s1369_s3 = smov 8   ;;  %s292_s18 = scalar_lea.hbm %s1331_s0, %s717_s23 }
  0x31   : > { %758 = dma.hbm_to_vmem [thread:$0]  (!%p1176_p5), %s265_s21, 512, %s267_s15, [#allocation9], %s1370_s16, %s1370_s16, %s1369_s3  }
  0x32   : > { %s294_s19 = sshll.u32 %s292_s18, 4  ;;  %s284_s1 = scalar_lea.sflag [#allocation3], %s1218_s9  ;;  %s295_s19 = int_to_ptr.hbm [resolvable:$true] %s294_s19 }
  0x33   : > { %762 = dma.hbm_to_vmem [thread:$0]  (!%p1220_p9), %s295_s19, 128, %s297_s22, %s284_s1  }
  0x34   : > { %s332_s6 = sshll.u32 %s330_s8, 4  ;;  %s326_s14 = scalar_lea.vmem [#allocation7], %s718_s13  ;;  %s333_s6 = int_to_ptr.hbm [resolvable:$true] %s332_s6 }
  0x35   : > { %s334_s2 = sshll.u32 %s326_s14, 4  ;;  %343 = sbr.rel (%p1168_p3) target bundleno = 607 (0x25f), region = 48  ;;  %s335_s2 = int_to_ptr.vmem [resolvable:$true] %s334_s2 }
  0x36   : > { %768 = dma.hbm_to_vmem [thread:$0]  (!%p1220_p9), %s333_s6, 32, %s335_s2, %s304_s24  }
  0x37   : > { %s1256_s21 = sand.u32 (!%p1168_p3), 1, %s1064_s25  }
  0x38   : > { %s723_s9 = sshll.u32 (!%p1168_p3), %s1256_s21, 3  ;;  %s346_s15 = scalar_lea.sflag (!%p1168_p3), [#allocation3], %s1256_s21 }
  0x39   : > { %s349_s1 = scalar_lea.vmem (!%p1168_p3), [#allocation2], %s723_s9 }
  0x3a   : > { %1043 = dma.done.wait (%p1198_p12), %s346_s15, 128  }
  0x3b   : > { %1045 = vsyncadd (%p1198_p12), %s346_s15, 4294967168  ;;  %s355_s2 = sand.u32 1, %s1160_s30   ;;  %s724_s24 = sshll.u32 %s1256_s21, 1 }
  0x3c   : > { %s356_s11 = scalar_lea.sflag [#allocation6], %s355_s2  ;;  %s359_s8 = scalar_lea.vmem [#allocation5], %s724_s24 }
  0x3d   : > { %1047 = dma.done.wait (%p1198_p12), %s356_s11, 64  }
  0x3e   : > { %1049 = vsyncadd (%p1198_p12), %s356_s11, 4294967232  ;;  %s1272_s10 = scalar_lea.vmem [#allocation7], %s724_s24 }
  0x3f   : > { %1051 = dma.done.wait (%p62_p1), [#allocation9], 1024  }
  0x40   : > { %1053 = vsyncadd (%p62_p1), [#allocation9], 4294966272  ;;  %v427_v0 = vld [vmem:[#allocation8 + $0x18] sm:$0xff]  ;;  %v426_v1 = vld [vmem:[#allocation8 + $0x10] sm:$0xff]  ;;  %vm432_vm0 = vcmask 261120   ;;  %s1086_s30 = smov 80  }
  0x41   : > { %448 = vmatpush.msra.mxu0 %v427_v0  ;;  %v425_v2 = vld [vmem:[#allocation8 + $0x8] sm:$0xff]  ;;  %v424_v3 = vld [vmem:[#allocation8] sm:$0xff]  ;;  %s1087_s3 = smov 112   ;;  %v422_v8 = vld [vmem:[%s359_s8] sm:$0x3]  ;;  %vm474_vm1 = vcmask 130048  }
  0x42   : > { %v421_v4 = vld [vmem:[%s349_s1] sm:$0xff]  ;;  %v486_v9 = vperm.slane %v422_v8, 1  ;;  %v472_v10 = vperm.slane %v422_v8, 0  ;;  %s1088_s16 = smov 96   ;;  %v498_v17 = vld [vmem:[#allocation10 + $0x18] sm:$0xff]  ;;  %v484_v20 = vld [vmem:[#allocation10] sm:$0xff] }
  0x43   : > { %449 = vmatpush.msra.mxu0 %v426_v1  ;;  %v834_v5 = vld [vmem:[%s1335_s4] ss:$0 sm:$0xff]  ;;  %v497_v19 = vld [vmem:[#allocation10 + $0x10] sm:$0xff]  ;;  %516 = vmatpush.msra.mxu1 %v498_v17  ;;  %v423_v25 = vld [vmem:[%s1272_s10] sm:$0x3]  ;;  %s733_s26 = sshll.u32 %s1072_s27, 3 }
  0x44   : > { %v485_v18 = vld [vmem:[#allocation10 + $0x8] sm:$0xff]  ;;  %v462_v28 = vperm.slane %v423_v25, 1  ;;  %v456_v29 = vperm.slane %v423_v25, 0  ;;  %s563_s17 = scalar_lea.hbm %s1338_s7, %s733_s26  ;;  %s1371_s29 = sld [smem:[#allocation26_spill]] }
  0x45   : > { %450 = vmatpush.msra.mxu0 %v425_v2  ;;  %539 = vmatpush.msra.mxu2 %v485_v18  ;;  %s420_s6 = scalar_lea.vmem [#allocation11], %s723_s9  ;;  %s567_s15 = sshll.u32 %s563_s17, 4  ;;  %s568_s15 = int_to_ptr.hbm [resolvable:$true] %s567_s15 }
  0x46   : > { %517 = vmatpush.msra.mxu1 %v497_v19  ;;  %s565_s14 = sshll.u32 %s420_s6, 4  ;;  %s552_s27 = scalar_lea.sflag [#allocation4], %s1256_s21  ;;  %s566_s14 = int_to_ptr.vmem [resolvable:$true] %s565_s14 }
  0x47   : > { %451 = vmatpush.msra.mxu0 %v424_v3  ;;  %540 = vmatpush.msra.mxu2 %v484_v20  ;;  %s1004_s1 = sshra.s32 %s568_s15, 4  ;;  %s1010_s9 = scalar_lea.hbm %s1338_s7, 16  ;;  %s1005_s1 = int_to_ptr.hbm [resolvable:$true] %s1004_s1 }
  0x48   : > { %729 = vmatmul.msk.f32.vlgmr.msra.gmra.mxu0 %vm432_vm0, %v421_v4  ;;  %s1006_s2 = scalar_lea.hbm %s1005_s1, 8  ;;  %p1011_p6 = scmp.lt.s32.totalorder %s1005_s1, %s1338_s7 }
  0x49   : > { %p1007_p1 = scmp.ne.s32.totalorder %s1005_s1, %s1006_s2  ;;  %p1012_p8 = scmp.lt.s32.totalorder %s1010_s9, %s1006_s2 }
  0x4a   : > { %v835_v43 = vld [vmem:[%s1371_s29] ss:$0 sm:$0xff] }
  0x4b   : > { %p1008_p3 = pnand %p1007_p1, %p1205_p4  ;;  %p1013_p10 = por %p1012_p8, %p1011_p6 }
  0x4d   : > { %p1009_p5 = pneg %p1008_p3 }
  0x4f   : > { %p1014_p11 = pnand %p1013_p10, %p1009_p5 }
  0xc5   : > { %v453_v6 = vpop.f32.mrf.mxu0 }
  0xc6   : > { %v454_v7 = vadd.f32 %v834_v5, %v453_v6 }
  0xc8   : > { %463 = vrot.lane.b32.xlu2 %v454_v7, %s1086_s30  ;;  %467 = vrot.lane.b32.xlu0 %v454_v7, %s1087_s3 }
 0x122   : > { %v464_v30 = vpop.permute.xlu2 %463 }
 0x123   : > { %v466_v34 = vadd.f32 %v464_v30, %v462_v28 }
 0x13a   : > { %v468_v11 = vpop.permute.xlu0 %467 }
 0x13b   : > { %v470_v12 = vsub.f32 %v454_v7, %v468_v11 }
 0x13d   : > { %v487_v13 = vmul.f32 %v486_v9, %v470_v12  ;;  %v473_v14 = vmul.f32 %v472_v10, %v470_v12 }
 0x13f   : > { %v488_v15 = vsel %vm474_vm1, %v487_v13, 0.0  ;;  %v475_v16 = vsel %vm474_vm1, %v473_v14, 0.0 }
 0x140   : > { %489 = vadd.xlane.f32.xlu1 %v488_v15  ;;  %476 = vadd.xlane.f32.xlu0 %v475_v16 }
 0x159   : > { %458 = vrot.lane.b32.xlu1 %v454_v7, %s1088_s16 }
 0x1b3   : > { %v490_v21 = vpop.xlane.xlu1 %489  ;;  %v477_v22 = vpop.xlane.xlu0 %476 }
 0x1b4   : > { %v491_v23 = vmul.f32 0.5, %v490_v21  ;;  %v478_v24 = vmul.f32 0.5, %v477_v22 }
 0x1b6   : > { %836 = vtanh.f32 %v491_v23 }
 0x1b7   : > { %838 = vtanh.f32 %v478_v24 }
 0x1bc   : > { %v837_v26 = vpop.eup %836 }
 0x1bd   : > { %v839_v27 = vpop.eup %838  ;;  %v493_v31 = vadd.f32 1.0, %v837_v26 }
 0x1be   : > { %v480_v32 = vadd.f32 1.0, %v839_v27 }
 0x1bf   : > { %v494_v36 = vmul.f32 0.5, %v493_v31 }
 0x1c0   : > { %v481_v37 = vmul.f32 0.5, %v480_v32 }
 0x1cb   : > { %v459_v33 = vpop.permute.xlu1 %458 }
 0x1cc   : > { %v461_v35 = vadd.f32 %v459_v33, %v456_v29 }
 0x1ce   : > { %v471_v38 = vsub.f32 %v461_v35, %v466_v34 }
 0x1d0   : > { %v482_v39 = vmul.f32 %v481_v37, %v471_v38  ;;  %v495_v40 = vmul.f32 %v494_v36, %v471_v38 }
 0x1d2   : > { %v496_v41 = vadd.f32 %v495_v40, %v466_v34  ;;  %v483_v42 = vadd.f32 %v482_v39, %v466_v34 }
 0x1d4   : > { %730 = vmatmul.msk.f32.vlgmr.msra.gmra.mxu1 %vm474_vm1, %v496_v41  ;;  %731 = vmatmul.msk.f32.vlgmr.msra.gmra.mxu2 %vm474_vm1, %v483_v42 }
 0x251   : > { %v519_v44 = vpop.f32.mrf.mxu1 }
 0x257   : > { %v542_v45 = vpop.f32.mrf.mxu2 }
 0x258   : > { %v543_v46 = vadd.f32 %v542_v45, %v519_v44 }
 0x25a   : > { %v549_v47 = vadd.f32 %v835_v43, %v543_v46 }
 0x25c   : > { %550 = vst.msk [vmem:[%s420_s6] sm:$0xff] %vm432_vm0, %v549_v47 }
 0x25d   : > { %1017 = shalt.err (!%p1014_p11)
}
 0x25e   : > { %750 = dma.vmem_to_hbm [thread:$0]  (%p1205_p4), %s566_s14, 128, %s568_s15, %s552_s27  }
 0x25f PF: > { %s1373_s21 = sld [smem:[#allocation16_spill]] }
 0x260   : > { %s1375_s13 = sld [smem:[#allocation18_spill]] }
 0x265   : > { %s579_s30 = sand.u32 1, %s1373_s21  }
 0x266   : > { %p1376_p12 = scmp.ge.s32.totalorder %s1375_s13, 2  ;;  %s580_s3 = scalar_lea.sflag [#allocation4], %s579_s30 }
 0x268   : > { %p770_p13 = pnand %p1376_p12, %p1213_p7 }
 0x26a   : > { %p771_p0 = pneg %p770_p13 }
 0x26c   : > { %1055 = dma.done.wait (%p771_p0), %s580_s3, 128  }
 0x26d   : > { %1057 = vsyncadd (%p771_p0), %s580_s3, 4294967168  ;;  %s27_s29 = sadd.s32 1, %s1375_s13   ;;  %s1377_s16 = sld [smem:[#allocation17_spill]] }
 0x26e   : > { %p24_p2 = scmp.ge.s32.totalorder %s27_s29, 4   ;;  %s1378_s26 = sld [smem:[#allocation21_spill]] }
 0x26f   : > { %s1379_s23 = sld [smem:[#allocation19_spill]]  ;;  %s1380_s24 = smov %s1064_s25 }
 0x270   : > { %s1382_s27 = smov %s1076_s28 }
 0x271   :  { %26 = sbr.rel (!%p24_p2) target bundleno = 14 (0xe), region = 125 }
 0x273   : > { %s1381_s25 = smov %s1377_s16 }
 0x275   : > { %s1383_s28 = smov %s1379_s23 }
 0x276   :  { %586 = vsyncpa [#allocation3], 1 }
 0x277   :  { %588 = vsyncpa [#allocation3 + $0x1], 1 }
 0x278   :  { %589 = vsyncpa [#allocation6], 1 }
 0x279   :  { %591 = vsyncpa [#allocation6 + $0x1], 1 }
 0x27a   :  { %592 = vsyncpa [#allocation9], 1 }
 0x27b   :  { %593 = vsyncpa [#allocation4], 1 }
 0x27c   :  { %595 = vsyncpa [#allocation4 + $0x1], 1 }

// kernel: tpu_custom_call.1
= control target key start
LH: loop header
LB: loop body
LE: loop exit
PB: predicated region body
PF: predicated region fallthrough
CT: control target
= control target key end

     0   :  { %s1331_s0 = inlined_call_operand.hbm [shape: f32[2,8,32], index: 0, kind: input, shape index: {}]   ;;  %s1332_s1 = inlined_call_operand.hbm [shape: f32[2,2,16], index: 1, kind: input, shape index: {}]   ;;  %s1333_s2 = inlined_call_operand.hbm [shape: f32[2,2,16], index: 2, kind: input, shape index: {}]   ;;  %s1334_s3 = inlined_call_operand.hbm [shape: f32[32,64], index: 3, kind: input, shape index: {}]   ;;  %s1335_s4 = inlined_call_operand.vmem [shape: f32[1,64], index: 4, kind: input, shape index: {}]   ;;  %s1336_s5 = inlined_call_operand.hbm [shape: f32[32,32], index: 5, kind: input, shape index: {}]   ;;  %s1337_s6 = inlined_call_operand.vmem [shape: f32[1,32], index: 6, kind: input, shape index: {}]   ;;  %s1338_s7 = inlined_call_operand.hbm [shape: f32[2,8,32], index: 7, kind: output, shape index: {}]  }
   0x1   :  { %1349 = sst [smem:[#allocation23_spill]] %s1332_s1 }
   0x2   :  { %1350 = sst [smem:[#allocation24_spill]] %s1333_s2 }
   0x3   :  { %1351 = sst [smem:[#allocation25_spill]] %s1334_s3 }
   0x4   :  { %1352 = sst [smem:[#allocation26_spill]] %s1337_s6 }
   0x5   :  { %12 = vsyncpa [#allocation3], 0 }
   0x6   :  { %14 = vsyncpa [#allocation3 + $0x1], 0 }
   0x7   :  { %15 = vsyncpa [#allocation6], 0 }
   0x8   :  { %17 = vsyncpa [#allocation6 + $0x1], 0 }
   0x9   :  { %18 = vsyncpa [#allocation9], 0 }
   0xa   :  { %19 = vsyncpa [#allocation4], 0 }
   0xb   :  { %21 = vsyncpa [#allocation4 + $0x1], 0  ;;  %s1129_s24 = smov 0   ;;  %s1131_s25 = smov 0  }
   0xc   :  { %s1133_s26 = smov 0   ;;  %s1135_s27 = smov 0  }
   0xd   :  { %s1137_s28 = smov 0   ;;  %s1139_s29 = smov 0  }
   0xe LB: > { %1353 = sst [smem:[#allocation16_spill]] %s1060_s24  ;;  %s1160_s30 = sadd.s32 4294967295, %s1080_s29   ;;  %s1080_s29 = sphi %s1139_s29, %s27_s29   ;;  %s1076_s28 = sphi %s1137_s28, %s1383_s28   ;;  %s1072_s27 = sphi %s1135_s27, %s1382_s27   ;;  %s1068_s26 = sphi %s1133_s26, %s1378_s26   ;;  %s1064_s25 = sphi %s1131_s25, %s1381_s25   ;;  %s1060_s24 = sphi %s1129_s24, %s1380_s24  }
   0xf   : > { %1354 = sst [smem:[#allocation17_spill]] %s1068_s26  ;;  %p712_p0 = scmp.ge.s32.totalorder %s1080_s29, 1 }
  0x10   : > { %1355 = sst [smem:[#allocation18_spill]] %s1080_s29  ;;  %p62_p1 = scmp.eq.s32.totalorder %s1160_s30, 0 }
  0x11   : > { %p236_p2 = scmp.lt.s32.totalorder %s1080_s29, 3  ;;  %s1356_s3 = sld [smem:[#allocation25_spill]] }
  0x12   : > { %s1082_s12 = smov [#allocation8]   ;;  %s1339_s15 = smov 128  }
  0x13   : > { %p1168_p3 = pnand %p712_p0, %p236_p2  ;;  %s249_s13 = sshll.u32 %s1082_s12, 4  ;;  %s250_s13 = int_to_ptr.vmem [resolvable:$true] %s249_s13 }
  0x14   : > { %s1340_s16 = smov 8   ;;  %s711_s17 = sadd.s32 4294967294, %s1080_s29  }
  0x15   : > { %p752_p4 = pneg %p1168_p3  ;;  %s39_s18 = sadd.s32 1, %s1076_s28 }
  0x16   : > { %s48_s19 = sadd.s32 1, %s1068_s26  ;;  %p41_p7 = scmp.ge.s32.totalorder %s39_s18, 2 }
  0x17   : > { %s247_s10 = sshll.u32 %s1356_s3, 4  ;;  %p1176_p5 = pnand %p752_p4, %p62_p1  ;;  %s248_s10 = int_to_ptr.hbm [resolvable:$true] %s247_s10 }
  0x18   : > { %p55_p8 = scmp.ne.s32.totalorder %s1068_s26, %s1064_s25  ;;  %p56_p9 = scmp.eq.s32.totalorder %s1080_s29, 0 }
  0x19   : > { %755 = dma.hbm_to_vmem [thread:$0]  (!%p1176_p5), %s248_s10, 512, %s250_s13, [#allocation9], %s1339_s15, %s1339_s15, %s1340_s16  }
  0x1a   : > { %p61_p10 = scmp.ne.s32.totalorder %s1064_s25, %s1060_s24  ;;  %s1385_s18 = smov (%p41_p7, %s39_s18), 0 }
  0x1b   : > { %1359 = sst [smem:[#allocation19_spill]] %s1385_s18  ;;  %p57_p11 = por %p56_p9, %p55_p8 }
  0x1c   : > { %p1198_p12 = por %p62_p1, %p61_p10  ;;  %s43_s21 = ssub.s32 %s1076_s28, %s1385_s18 }
  0x1d   : > { %p223_p13 = scmp.eq.s32.totalorder %s1160_s30, 1  ;;  %p46_p0 = scmp.eq.s32.totalorder %s43_s21, 0 }
  0x1e   : > { %p229_p2 = scmp.eq.s32.totalorder %s711_s17, 1  ;;  %p775_p6 = scmp.lt.s32.totalorder %s1080_s29, 2 }
  0x1f   : > { %p1205_p4 = por %p223_p13, %p55_p8  ;;  %s1218_s9 = sand.u32 1, %s1068_s26  }
  0x20   : > { %s1211_s23 = scalar_select %p46_p0, %s1068_s26, %s48_s19  }
  0x21   : > { %s1361_s22 = scalar_select %p1205_p4, 1, 0 }
  0x22   : > { %1363 = sst [smem:[#allocation21_spill]] %s1211_s23  ;;  %p1213_p7 = por %p229_p2, %p61_p10 }
  0x23   : > { %1362 = sst [smem:[#allocation20_spill]] %s1361_s22  ;;  %p1220_p9 = pnand %p775_p6, %p57_p11 }
  0x24   : > { %s1364_s8 = scalar_select %p1213_p7, 1, 0 }
  0x25   : > { %s303_s12 = sand.u32 1, %s1080_s29   ;;  %s718_s13 = sshll.u32 %s1218_s9, 1 }
  0x26   : > { %1365 = sst [smem:[#allocation22_spill]] %s1364_s8  ;;  %s719_s17 = sshll.u32 %s1076_s28, 1 }
  0x27   : > { %s307_s21 = scalar_lea.vmem [#allocation5], %s718_s13  ;;  %s1367_s1 = sld [smem:[#allocation23_spill]] }
  0x28   : > { %s315_s19 = sshll.u32 %s307_s21, 4  ;;  %s1368_s2 = sld [smem:[#allocation24_spill]]  ;;  %s316_s19 = int_to_ptr.vmem [resolvable:$true] %s315_s19 }
  0x29   : > { %s304_s24 = scalar_lea.sflag [#allocation6], %s303_s12  ;;  %s264_s21 = sshll.u32 %s1336_s5, 4  ;;  %s265_s21 = int_to_ptr.hbm [resolvable:$true] %s264_s21 }
  0x2a   : > { %s1085_s6 = smov [#allocation10]   ;;  %s1370_s16 = smov 128  }
  0x2b   : > { %s266_s15 = sshll.u32 %s1085_s6, 4  ;;  %s716_s26 = sshll.u32 %s1218_s9, 3  ;;  %s267_s15 = int_to_ptr.vmem [resolvable:$true] %s266_s15 }
  0x2c   : > { %s717_s23 = sshll.u32 %s1076_s28, 3  ;;  %s287_s29 = scalar_lea.vmem [#allocation2], %s716_s26 }
  0x2d   : > { %s311_s3 = scalar_lea.hbm %s1367_s1, %s719_s17  ;;  %s296_s22 = sshll.u32 %s287_s29, 4  ;;  %s297_s22 = int_to_ptr.vmem [resolvable:$true] %s296_s22 }
  0x2e   : > { %s313_s18 = sshll.u32 %s311_s3, 4  ;;  %s330_s8 = scalar_lea.hbm %s1368_s2, %s719_s17  ;;  %s314_s18 = int_to_ptr.hbm [resolvable:$true] %s313_s18 }
  0x2f   : > { %765 = dma.hbm_to_vmem [thread:$0]  (!%p1220_p9), %s314_s18, 32, %s316_s19, %s304_s24  }
  0x30   : > { %s1369_s3 = smov 8   ;;  %s292_s18 = scalar_lea.hbm %s1331_s0, %s717_s23 }
  0x31   : > { %758 = dma.hbm_to_vmem [thread:$0]  (!%p1176_p5), %s265_s21, 512, %s267_s15, [#allocation9], %s1370_s16, %s1370_s16, %s1369_s3  }
  0x32   : > { %s294_s19 = sshll.u32 %s292_s18, 4  ;;  %s284_s1 = scalar_lea.sflag [#allocation3], %s1218_s9  ;;  %s295_s19 = int_to_ptr.hbm [resolvable:$true] %s294_s19 }
  0x33   : > { %762 = dma.hbm_to_vmem [thread:$0]  (!%p1220_p9), %s295_s19, 128, %s297_s22, %s284_s1  }
  0x34   : > { %s332_s6 = sshll.u32 %s330_s8, 4  ;;  %s326_s14 = scalar_lea.vmem [#allocation7], %s718_s13  ;;  %s333_s6 = int_to_ptr.hbm [resolvable:$true] %s332_s6 }
  0x35   : > { %s334_s2 = sshll.u32 %s326_s14, 4  ;;  %343 = sbr.rel (%p1168_p3) target bundleno = 607 (0x25f), region = 48  ;;  %s335_s2 = int_to_ptr.vmem [resolvable:$true] %s334_s2 }
  0x36   : > { %768 = dma.hbm_to_vmem [thread:$0]  (!%p1220_p9), %s333_s6, 32, %s335_s2, %s304_s24  }
  0x37   : > { %s1256_s21 = sand.u32 (!%p1168_p3), 1, %s1064_s25  }
  0x38   : > { %s723_s9 = sshll.u32 (!%p1168_p3), %s1256_s21, 3  ;;  %s346_s15 = scalar_lea.sflag (!%p1168_p3), [#allocation3], %s1256_s21 }
  0x39   : > { %s349_s1 = scalar_lea.vmem (!%p1168_p3), [#allocation2], %s723_s9 }
  0x3a   : > { %1043 = dma.done.wait (%p1198_p12), %s346_s15, 128  }
  0x3b   : > { %1045 = vsyncadd (%p1198_p12), %s346_s15, 4294967168  ;;  %s355_s2 = sand.u32 1, %s1160_s30   ;;  %s724_s24 = sshll.u32 %s1256_s21, 1 }
  0x3c   : > { %s356_s11 = scalar_lea.sflag [#allocation6], %s355_s2  ;;  %s359_s8 = scalar_lea.vmem [#allocation5], %s724_s24 }
  0x3d   : > { %1047 = dma.done.wait (%p1198_p12), %s356_s11, 64  }
  0x3e   : > { %1049 = vsyncadd (%p1198_p12), %s356_s11, 4294967232  ;;  %s1272_s10 = scalar_lea.vmem [#allocation7], %s724_s24 }
  0x3f   : > { %1051 = dma.done.wait (%p62_p1), [#allocation9], 1024  }
  0x40   : > { %1053 = vsyncadd (%p62_p1), [#allocation9], 4294966272  ;;  %v427_v0 = vld [vmem:[#allocation8 + $0x18] sm:$0xff]  ;;  %v426_v1 = vld [vmem:[#allocation8 + $0x10] sm:$0xff]  ;;  %vm432_vm0 = vcmask 261120   ;;  %s1086_s30 = smov 80  }
  0x41   : > { %448 = vmatpush.msra.mxu0 %v427_v0  ;;  %v425_v2 = vld [vmem:[#allocation8 + $0x8] sm:$0xff]  ;;  %v424_v3 = vld [vmem:[#allocation8] sm:$0xff]  ;;  %s1087_s3 = smov 112   ;;  %v422_v8 = vld [vmem:[%s359_s8] sm:$0x3]  ;;  %vm474_vm1 = vcmask 130048  }
  0x42   : > { %v421_v4 = vld [vmem:[%s349_s1] sm:$0xff]  ;;  %v486_v9 = vperm.slane %v422_v8, 1  ;;  %v472_v10 = vperm.slane %v422_v8, 0  ;;  %s1088_s16 = smov 96   ;;  %v498_v17 = vld [vmem:[#allocation10 + $0x18] sm:$0xff]  ;;  %v484_v20 = vld [vmem:[#allocation10] sm:$0xff] }
  0x43   : > { %449 = vmatpush.msra.mxu0 %v426_v1  ;;  %v834_v5 = vld [vmem:[%s1335_s4] ss:$0 sm:$0xff]  ;;  %v497_v19 = vld [vmem:[#allocation10 + $0x10] sm:$0xff]  ;;  %516 = vmatpush.msra.mxu1 %v498_v17  ;;  %v423_v25 = vld [vmem:[%s1272_s10] sm:$0x3]  ;;  %s733_s26 = sshll.u32 %s1072_s27, 3 }
  0x44   : > { %v485_v18 = vld [vmem:[#allocation10 + $0x8] sm:$0xff]  ;;  %v462_v28 = vperm.slane %v423_v25, 1  ;;  %v456_v29 = vperm.slane %v423_v25, 0  ;;  %s563_s17 = scalar_lea.hbm %s1338_s7, %s733_s26  ;;  %s1371_s29 = sld [smem:[#allocation26_spill]] }
  0x45   : > { %450 = vmatpush.msra.mxu0 %v425_v2  ;;  %539 = vmatpush.msra.mxu2 %v485_v18  ;;  %s420_s6 = scalar_lea.vmem [#allocation11], %s723_s9  ;;  %s567_s15 = sshll.u32 %s563_s17, 4  ;;  %s568_s15 = int_to_ptr.hbm [resolvable:$true] %s567_s15 }
  0x46   : > { %517 = vmatpush.msra.mxu1 %v497_v19  ;;  %s565_s14 = sshll.u32 %s420_s6, 4  ;;  %s552_s27 = scalar_lea.sflag [#allocation4], %s1256_s21  ;;  %s566_s14 = int_to_ptr.vmem [resolvable:$true] %s565_s14 }
  0x47   : > { %451 = vmatpush.msra.mxu0 %v424_v3  ;;  %540 = vmatpush.msra.mxu2 %v484_v20  ;;  %s1004_s1 = sshra.s32 %s568_s15, 4  ;;  %s1010_s9 = scalar_lea.hbm %s1338_s7, 16  ;;  %s1005_s1 = int_to_ptr.hbm [resolvable:$true] %s1004_s1 }
  0x48   : > { %729 = vmatmul.msk.f32.vlgmr.msra.gmra.mxu0 %vm432_vm0, %v421_v4  ;;  %s1006_s2 = scalar_lea.hbm %s1005_s1, 8  ;;  %p1011_p6 = scmp.lt.s32.totalorder %s1005_s1, %s1338_s7 }
  0x49   : > { %p1007_p1 = scmp.ne.s32.totalorder %s1005_s1, %s1006_s2  ;;  %p1012_p8 = scmp.lt.s32.totalorder %s1010_s9, %s1006_s2 }
  0x4a   : > { %v835_v43 = vld [vmem:[%s1371_s29] ss:$0 sm:$0xff] }
  0x4b   : > { %p1008_p3 = pnand %p1007_p1, %p1205_p4  ;;  %p1013_p10 = por %p1012_p8, %p1011_p6 }
  0x4d   : > { %p1009_p5 = pneg %p1008_p3 }
  0x4f   : > { %p1014_p11 = pnand %p1013_p10, %p1009_p5 }
  0xc5   : > { %v453_v6 = vpop.f32.mrf.mxu0 }
  0xc6   : > { %v454_v7 = vadd.f32 %v834_v5, %v453_v6 }
  0xc8   : > { %463 = vrot.lane.b32.xlu2 %v454_v7, %s1086_s30  ;;  %467 = vrot.lane.b32.xlu0 %v454_v7, %s1087_s3 }
 0x122   : > { %v464_v30 = vpop.permute.xlu2 %463 }
 0x123   : > { %v466_v34 = vadd.f32 %v464_v30, %v462_v28 }
 0x13a   : > { %v468_v11 = vpop.permute.xlu0 %467 }
 0x13b   : > { %v470_v12 = vsub.f32 %v454_v7, %v468_v11 }
 0x13d   : > { %v487_v13 = vmul.f32 %v486_v9, %v470_v12  ;;  %v473_v14 = vmul.f32 %v472_v10, %v470_v12 }
 0x13f   : > { %v488_v15 = vsel %vm474_vm1, %v487_v13, 0.0  ;;  %v475_v16 = vsel %vm474_vm1, %v473_v14, 0.0 }
 0x140   : > { %489 = vadd.xlane.f32.xlu1 %v488_v15  ;;  %476 = vadd.xlane.f32.xlu0 %v475_v16 }
 0x159   : > { %458 = vrot.lane.b32.xlu1 %v454_v7, %s1088_s16 }
 0x1b3   : > { %v490_v21 = vpop.xlane.xlu1 %489  ;;  %v477_v22 = vpop.xlane.xlu0 %476 }
 0x1b4   : > { %v491_v23 = vmul.f32 0.5, %v490_v21  ;;  %v478_v24 = vmul.f32 0.5, %v477_v22 }
 0x1b6   : > { %836 = vtanh.f32 %v491_v23 }
 0x1b7   : > { %838 = vtanh.f32 %v478_v24 }
 0x1bc   : > { %v837_v26 = vpop.eup %836 }
 0x1bd   : > { %v839_v27 = vpop.eup %838  ;;  %v493_v31 = vadd.f32 1.0, %v837_v26 }
 0x1be   : > { %v480_v32 = vadd.f32 1.0, %v839_v27 }
 0x1bf   : > { %v494_v36 = vmul.f32 0.5, %v493_v31 }
 0x1c0   : > { %v481_v37 = vmul.f32 0.5, %v480_v32 }
 0x1cb   : > { %v459_v33 = vpop.permute.xlu1 %458 }
 0x1cc   : > { %v461_v35 = vadd.f32 %v459_v33, %v456_v29 }
 0x1ce   : > { %v471_v38 = vsub.f32 %v461_v35, %v466_v34 }
 0x1d0   : > { %v482_v39 = vmul.f32 %v481_v37, %v471_v38  ;;  %v495_v40 = vmul.f32 %v494_v36, %v471_v38 }
 0x1d2   : > { %v496_v41 = vadd.f32 %v495_v40, %v466_v34  ;;  %v483_v42 = vadd.f32 %v482_v39, %v466_v34 }
 0x1d4   : > { %730 = vmatmul.msk.f32.vlgmr.msra.gmra.mxu1 %vm474_vm1, %v496_v41  ;;  %731 = vmatmul.msk.f32.vlgmr.msra.gmra.mxu2 %vm474_vm1, %v483_v42 }
 0x251   : > { %v519_v44 = vpop.f32.mrf.mxu1 }
 0x257   : > { %v542_v45 = vpop.f32.mrf.mxu2 }
 0x258   : > { %v543_v46 = vadd.f32 %v542_v45, %v519_v44 }
 0x25a   : > { %v549_v47 = vadd.f32 %v835_v43, %v543_v46 }
 0x25c   : > { %550 = vst.msk [vmem:[%s420_s6] sm:$0xff] %vm432_vm0, %v549_v47 }
 0x25d   : > { %1017 = shalt.err (!%p1014_p11)
}
 0x25e   : > { %750 = dma.vmem_to_hbm [thread:$0]  (%p1205_p4), %s566_s14, 128, %s568_s15, %s552_s27  }
 0x25f PF: > { %s1373_s21 = sld [smem:[#allocation16_spill]] }
 0x260   : > { %s1375_s13 = sld [smem:[#allocation18_spill]] }
 0x265   : > { %s579_s30 = sand.u32 1, %s1373_s21  }
 0x266   : > { %p1376_p12 = scmp.ge.s32.totalorder %s1375_s13, 2  ;;  %s580_s3 = scalar_lea.sflag [#allocation4], %s579_s30 }
 0x268   : > { %p770_p13 = pnand %p1376_p12, %p1213_p7 }
 0x26a   : > { %p771_p0 = pneg %p770_p13 }
 0x26c   : > { %1055 = dma.done.wait (%p771_p0), %s580_s3, 128  }
 0x26d   : > { %1057 = vsyncadd (%p771_p0), %s580_s3, 4294967168  ;;  %s27_s29 = sadd.s32 1, %s1375_s13   ;;  %s1377_s16 = sld [smem:[#allocation17_spill]] }
 0x26e   : > { %p24_p2 = scmp.ge.s32.totalorder %s27_s29, 4   ;;  %s1378_s26 = sld [smem:[#allocation21_spill]] }
 0x26f   : > { %s1379_s23 = sld [smem:[#allocation19_spill]]  ;;  %s1380_s24 = smov %s1064_s25 }
 0x270   : > { %s1382_s27 = smov %s1076_s28 }
 0x271   :  { %26 = sbr.rel (!%p24_p2) target bundleno = 14 (0xe), region = 125 }
 0x273   : > { %s1381_s25 = smov %s1377_s16 }
 0x275   : > { %s1383_s28 = smov %s1379_s23 }
 0x276   :  { %586 = vsyncpa [#allocation3], 1 }
 0x277   :  { %588 = vsyncpa [#allocation3 + $0x1], 1 }
 0x278   :  { %589 = vsyncpa [#allocation6], 1 }
 0x279   :  { %591 = vsyncpa [#allocation6 + $0x1], 1 }
 0x27a   :  { %592 = vsyncpa [#allocation9], 1 }
 0x27b   :  { %593 = vsyncpa [#allocation4], 1 }
 0x27c   :  { %595 = vsyncpa [#allocation4 + $0x1], 1 }

</bundles_post_ra>
